<compile_context>
chip_gen: v5e
topology: v5e:2x2
jax: 0.10.0
libtpu: 0.0.40
codegen_flags: <defaults>
</compile_context>

<pallas_src>
import jax
import jax.numpy as jnp
from jax.experimental import pallas as pl
from jax.experimental.pallas import tpu as pltpu


def _copy_kernel(x_ref, o_ref):
    # Input block == output block (chomp already applied via the L_out-tiled
    # grid / BlockSpecs): pure full-tile VMEM copy.
    o_ref[...] = x_ref[...]


def _round_down(x, m):
    return (x // m) * m


def _round_up(x, m):
    return ((x + m - 1) // m) * m


def _vmem_capacity_bytes() -> int:
    """Physical VMEM of the current TPU generation (conservative fallback)."""
    try:
        info = pltpu.get_tpu_info()
        for attr in ("vmem_capacity_bytes", "vmem_size_bytes", "vmem_bytes"):
            v = getattr(info, attr, None)
            if v:
                return int(v)
    except Exception:
        pass
    try:
        kind = jax.devices()[0].device_kind.lower()
        if "v5" in kind or "v6" in kind:
            return 128 * 1024 * 1024
    except Exception:
        pass
    return 64 * 1024 * 1024  # v7x-safe default


def chomp1d(x: jax.Array, chomp_size: int, *,
            min_pallas_bytes: int = 256 * 1024) -> jax.Array:
    """Pallas implementation of Chomp1d.forward (drop last `chomp_size` steps)."""
    n, c, l = x.shape
    assert 0 < chomp_size < l, "require 0 < chomp_size < L"
    l_out = l - chomp_size

    r = n * c
    itemsize = jnp.dtype(x.dtype).itemsize
    out_bytes = r * l_out * itemsize

    # ---- tiny problems: kernel launch + pipeline fixed cost dominates, and an
    # output last dim < 128 lanes would force masked partial stores. A plain
    # XLA slice is at least as fast and can fuse with neighbors.
    if l_out < 128 or out_bytes < min_pallas_bytes:
        return x[:, :, :l_out]

    # Flatten (N, C) -> R so the sublane axis is densely packed.
    x2 = x.reshape(r, l)
    sublane = 8 * max(1, 4 // itemsize)  # 8 for f32, 16 for bf16, 32 for int8

    # ---- generation-aware byte budgets (bigger blocks on 128 MiB-VMEM chips).
    if _vmem_capacity_bytes() >= 128 * 1024 * 1024:   # v5e / v6e
        block_byte_target = 8 * 1024 * 1024
        vmem_cap = 96 * 1024 * 1024
    else:                                             # v7x (64 MiB) / unknown
        block_byte_target = 4 * 1024 * 1024
        vmem_cap = 48 * 1024 * 1024
    elem_budget = max(block_byte_target // itemsize, 128 * sublane)

    # ---- lane (last-dim) tile: a 128-multiple, balanced over L_out so the
    # last block is never nearly-empty; capped so at least one packed sublane
    # group of rows still fits in the per-block byte budget.
    lane_cap = max(128, _round_down(elem_budget // sublane, 128))
    lane_chunk = min(lane_cap, _round_up(l_out, 128))
    lane_tile = _round_up(pl.cdiv(l_out, pl.cdiv(l_out, lane_chunk)), 128)
    lane_grid = pl.cdiv(l_out, lane_tile)

    # ---- row (sublane) tile: dtype-packed multiple (or the full extent when
    # R is small), balanced, sized from the remaining byte budget.
    if r < 2 * sublane:
        row_tile = r                          # full dim is always a legal block
    else:
        row_cap = max(sublane, _round_down(elem_budget // lane_tile, sublane))
        row_grid0 = pl.cdiv(r, min(row_cap, r))
        row_tile = _round_up(pl.cdiv(r, row_grid0), sublane)
        if row_tile >= r:
            row_tile = r
    row_grid = pl.cdiv(r, row_tile)

    # ---- v7x: guarantee >= 2 blocks on a "parallel" axis so the second
    # TensorCore is not idle; split lanes first (keeps sublane packing intact).
    if row_grid * lane_grid < 2:
        if lane_tile >= 256:
            lane_tile = _round_up(pl.cdiv(l_out, 2), 128)
            lane_grid = pl.cdiv(l_out, lane_tile)
        elif row_tile >= 2 * sublane:
            row_tile = max(sublane, _round_down(pl.cdiv(row_tile, 2), sublane))
            row_grid = pl.cdiv(r, row_tile)

    block_bytes = row_tile * lane_tile * itemsize
    # Double-buffered input + output blocks plus headroom; explicit limit so
    # the kernel stays well inside v7x's 64 MiB physical VMEM.
    vmem_limit = int(min(max(6 * block_bytes, 4 * 1024 * 1024), vmem_cap))

    out2 = pl.pallas_call(
        _copy_kernel,
        out_shape=jax.ShapeDtypeStruct((r, l_out), x.dtype),
        grid_spec=pltpu.PrefetchScalarGridSpec(
            num_scalar_prefetch=0,
            grid=(row_grid, lane_grid),
            in_specs=[pl.BlockSpec((row_tile, lane_tile), lambda i, j: (i, j))],
            out_specs=pl.BlockSpec((row_tile, lane_tile), lambda i, j: (i, j)),
        ),
        compiler_params=pltpu.CompilerParams(
            dimension_semantics=("parallel", "parallel"),
            vmem_limit_bytes=vmem_limit,
        ),
    )(x2)

    return out2.reshape(n, c, l_out)


if __name__ == "__main__":
    key = jax.random.PRNGKey(0)
    k1, k2, k3 = jax.random.split(key, 3)

    # 1) Small shape matching the module's typical usage: takes the tiny-shape
    #    XLA-slice fast path (per perf review).
    N, C, L, chomp = 2, 4, 16, 3
    x_small = jax.random.normal(k1, (N, C, L), dtype=jnp.float32)
    out_small = jax.block_until_ready(chomp1d(x_small, chomp))
    assert out_small.shape == (N, C, L - chomp), out_small.shape
    assert out_small.dtype == x_small.dtype
    assert jnp.array_equal(out_small, x_small[:, :, : L - chomp]), "small mismatch"

    # 2) bf16 with L_out not a multiple of 128 and lane_tile > remaining cols:
    #    exercises the Pallas path with clipped (partial) lane blocks.
    N2, C2, L2, chomp2 = 2, 8, 384, 3
    x_bf16 = jax.random.normal(k2, (N2, C2, L2), dtype=jnp.bfloat16)
    out_bf16 = jax.block_until_ready(chomp1d(x_bf16, chomp2, min_pallas_bytes=0))
    assert out_bf16.shape == (N2, C2, L2 - chomp2), out_bf16.shape
    assert out_bf16.dtype == x_bf16.dtype
    assert jnp.array_equal(out_bf16, x_bf16[:, :, : L2 - chomp2]), "bf16 mismatch"

    # 3) f32 case above the tiny threshold: default Pallas path with balanced
    #    lane tiles and >= 2 "parallel" blocks (v7x 2-TC split).
    N3, C3, L3, chomp3 = 4, 64, 1027, 3
    x_f32 = jax.random.normal(k3, (N3, C3, L3), dtype=jnp.float32)
    out_f32 = jax.block_until_ready(chomp1d(x_f32, chomp3))
    assert out_f32.shape == (N3, C3, L3 - chomp3), out_f32.shape
    assert out_f32.dtype == x_f32.dtype
    assert jnp.array_equal(out_f32, x_f32[:, :, : L3 - chomp3]), "f32 mismatch"

    print("KERNEL_OK")
</pallas_src>

<mosaic_0001>
module attributes {stable_mosaic.version = 11 : i64} {
  func.func @_copy_kernel(%arg0: i32, %arg1: i32, %arg2: memref<16x256xbf16, #tpu.memory_space<vmem>>, %arg3: memref<16x256xbf16, #tpu.memory_space<vmem>>) attributes {dimension_semantics = [#tpu.dimension_semantics<parallel>, #tpu.dimension_semantics<parallel>], iteration_bounds = array<i64: 1, 2>, scalar_prefetch = 0 : i64, scratch_operands = 0 : i64, tpu.core_type = #tpu.core_type<tc>, window_params = [{transform_indices = @transform_0, window_bounds = array<i64: 16, 256>}, {transform_indices = @transform_1, window_bounds = array<i64: 16, 256>}]} {
    %c0 = arith.constant 0 : index
    %c0_0 = arith.constant 0 : index
    %0 = vector.load %arg2[%c0, %c0_0] : memref<16x256xbf16, #tpu.memory_space<vmem>>, vector<16x256xbf16>
    %c0_1 = arith.constant 0 : index
    %c0_2 = arith.constant 0 : index
    %1 = vector.load %arg3[%c0_1, %c0_2] : memref<16x256xbf16, #tpu.memory_space<vmem>>, vector<16x256xbf16>
    tpu.vector_store %arg3[%c0_1, %c0_2], %0 {strides = array<i32>} : memref<16x256xbf16, #tpu.memory_space<vmem>>, vector<16x256xbf16>,
    return
  }
  func.func @transform_0(%arg0: i32, %arg1: i32) -> (i32, i32) {
    %c0_i32 = arith.constant 0 : i32
    return %arg0, %arg1 : i32, i32
  }
  func.func @transform_1(%arg0: i32, %arg1: i32) -> (i32, i32) {
    %c0_i32 = arith.constant 0 : i32
    return %arg0, %arg1 : i32, i32
  }
}

</mosaic_0001>

<bundles_post_ra>
// kernel: tpu_custom_call.1
= control target key start
LH: loop header
LB: loop body
LE: loop exit
PB: predicated region body
PF: predicated region fallthrough
CT: control target
= control target key end

     0   :  { %6 = vsyncpa [#allocation3], 0  ;;  %s721_s0 = inlined_call_operand.hbm [shape: bf16[16,384], index: 0, kind: input, shape index: {}]   ;;  %s722_s1 = inlined_call_operand.hbm [shape: bf16[16,381], index: 1, kind: output, shape index: {}]  }
   0x1   :  { %8 = vsyncpa [#allocation3 + $0x1], 0 }
   0x2   :  { %9 = vsyncpa [#allocation4], 0 }
   0x3   :  { %11 = vsyncpa [#allocation4 + $0x1], 0  ;;  %s534_s6 = smov 0   ;;  %s536_s7 = smov 0  }
   0x4   :  { %s538_s8 = smov 0   ;;  %s540_s9 = smov 0  }
   0x5   :  { %s542_s10 = smov 0   ;;  %s544_s11 = smov 0  }
   0x6 LB: > { %s294_s12 = sadd.s32 4294967295, %s516_s11   ;;  %s295_s13 = sadd.s32 4294967294, %s516_s11   ;;  %s516_s11 = sphi %s544_s11, %s17_s11   ;;  %s512_s10 = sphi %s542_s10, %s732_s10   ;;  %s508_s9 = sphi %s540_s9, %s731_s9   ;;  %s504_s8 = sphi %s538_s8, %s730_s8   ;;  %s500_s7 = sphi %s536_s7, %s729_s7   ;;  %s496_s6 = sphi %s534_s6, %s728_s6  }
   0x7   : > { %s26_s14 = sadd.s32 1, %s512_s10  ;;  %s38_s15 = sadd.s32 1, %s504_s8 }
   0x8   : > { %p27_p0 = scmp.ge.s32.totalorder %s26_s14, 2  ;;  %p45_p1 = scmp.ne.s32.totalorder %s504_s8, %s500_s7 }
   0x9   : > { %p46_p2 = scmp.eq.s32.totalorder %s516_s11, 0  ;;  %p51_p3 = scmp.ne.s32.totalorder %s500_s7, %s496_s6 }
   0xa   : > { %s734_s14 = smov (%p27_p0, %s26_s14), 0  ;;  %p52_p5 = scmp.eq.s32.totalorder %s294_s12, 0 }
   0xb   : > { %p47_p4 = por %p46_p2, %p45_p1  ;;  %s34_s16 = ssub.s32 %s512_s10, %s734_s14 }
   0xc   : > { %p77_p6 = scmp.eq.s32.totalorder %s294_s12, 1  ;;  %p36_p7 = scmp.eq.s32.totalorder %s34_s16, 0 }
   0xd   : > { %p577_p8 = por %p52_p5, %p51_p3  ;;  %p83_p10 = scmp.eq.s32.totalorder %s295_s13, 1 }
   0xe   : > { %p581_p9 = por %p77_p6, %p45_p1  ;;  %p297_p12 = scmp.ge.s32.totalorder %s516_s11, 2 }
   0xf   : > { %s586_s19 = scalar_select %p36_p7, %s504_s8, %s38_s15  }
  0x10   : > { %p588_p11 = por %p83_p10, %p51_p3  ;;  %99 = sbr.rel (%p297_p12) target bundleno = 58 (0x3a), region = 16 }
  0x15   : > { %102 = sbr.rel (!%p47_p4) target bundleno = 58 (0x3a), region = 20  ;;  %s103_s21 = sand.u32 (%p47_p4), 1, %s504_s8  }
  0x16   : > { %s299_s22 = sshll.u32 (%p47_p4), %s512_s10, 1  ;;  %s298_s23 = sshll.u32 (%p47_p4), %s103_s21, 4 }
  0x17   : > { %s110_s24 = ssub.s32 (%p47_p4), 3, %s299_s22  ;;  %s600_s28 = scalar_lea.sflag (%p47_p4), [#allocation3], %s103_s21 }
  0x18   : > { %p111_p13 = scmp.lt.s32.totalorder (%p47_p4), %s110_s24, 2  ;;  %s107_s29 = scalar_lea.vmem (%p47_p4), [#allocation2], %s298_s23 }
  0x1a   : > { %s736_s24 = smov (!%p111_p13, %s110_s24), 2 }
  0x1b   : > { %s300_s25 = sshll.u32 %s736_s24, 3 }
  0x1c   : > { %s114_s26 = ssub.s32 16, %s300_s25 }
  0x1d   : > { %s115_s27 = sshll.u32 %s114_s26, 4 }
  0x1e   : > { %116 = vsyncadd %s600_s28, %s115_s27  ;;  %p603_p0 = scmp.ne.s32.totalorder %s300_s25, 0  ;;  %s319_s2 = sshll.u32 %s512_s10, 3 }
  0x1f   : > { %s121_s5 = scalar_lea.hbm %s721_s0, %s319_s2  ;;  %s303_s12 = sshll.u32 %s736_s24, 2 }
  0x20   : > { %s124_s13 = sshll.u32 %s121_s5, 4  ;;  %s612_s15 = sshll.u32 %s107_s29, 4  ;;  %s614_s13 = int_to_ptr.hbm [resolvable:$true] %s124_s13  ;;  %s127_s15 = int_to_ptr.vmem [resolvable:$true] %s612_s15 }
  0x21   : > { %s321_s16 = sshll.u32 %s736_s24, 7  ;;  %s384_s21 = sshra.s32 %s614_s13, 4  ;;  %s385_s21 = int_to_ptr.hbm [resolvable:$true] %s384_s21 }
  0x22   : > { %s386_s22 = sshrl.u32 %s321_s16, 4  ;;  %s395_s27 = scalar_lea.hbm %s721_s0, 24 }
  0x23   : > { %s391_s23 = scalar_lea.hbm %s385_s21, %s386_s22 }
  0x24   : > { %p392_p1 = scmp.ne.s32.totalorder %s385_s21, %s391_s23  ;;  %p397_p4 = scmp.lt.s32.totalorder %s395_s27, %s391_s23 }
  0x26   : > { %p393_p2 = pnand %p392_p1, %p603_p0 }
  0x28   : > { %p394_p3 = pneg %p393_p2 }
  0x2a   : > { %p399_p5 = pnand %p397_p4, %p394_p3 }
  0x2c   : > { %402 = shalt.err (!%p399_p5)
}
  0x2d   : > { %s403_s29 = sshra.s32 %s127_s15, 4  ;;  %s518_s3 = smov [#allocation2]   ;;  %s404_s29 = int_to_ptr.vmem [resolvable:$true] %s403_s29 }
  0x2e   : > { %s410_s2 = scalar_lea.vmem %s404_s29, %s386_s22  ;;  %s414_s4 = scalar_lea.vmem %s518_s3, 32 }
  0x2f   : > { %p411_p6 = scmp.ne.s32.totalorder %s404_s29, %s410_s2  ;;  %p416_p13 = scmp.lt.s32.totalorder %s414_s4, %s410_s2 }
  0x31   : > { %p412_p7 = pnand %p411_p6, %p603_p0 }
  0x33   : > { %p413_p10 = pneg %p412_p7 }
  0x35   : > { %p418_p1 = pnand %p416_p13, %p413_p10 }
  0x37   : > { %421 = shalt.err (!%p418_p1)
}
  0x38   : > { %s519_s5 = smov 192   ;;  %s520_s21 = smov 128  }
  0x39   : > { %132 = dma.hbm_to_vmem [thread:$0]  (%p603_p0), %s614_s13, %s321_s16, %s127_s15, %s600_s28, %s519_s5, %s520_s21, %s303_s12  }
  0x3a PF: > { %p306_p2 = scmp.ge.s32.totalorder %s516_s11, 1  ;;  %p134_p3 = scmp.lt.s32.totalorder %s516_s11, 3 }
  0x3c   : > { %p135_p4 = pnand %p306_p2, %p134_p3 }
  0x3d   : > { %s643_s22 = sand.u32 (!%p135_p4), 1, %s500_s7  }
  0x3e   : > { %138 = sbr.rel (%p135_p4) target bundleno = 106 (0x6a), region = 24  ;;  %s307_s23 = sshll.u32 (!%p135_p4), %s643_s22, 4 }
  0x3f   : > { %s141_s30 = scalar_lea.sflag (!%p135_p4), [#allocation3], %s643_s22  ;;  %s144_s25 = scalar_lea.vmem (!%p135_p4), [#allocation2], %s307_s23 }
  0x43   : > { %487 = dma.done.wait (%p577_p8), %s141_s30, 256  }
  0x44   : > { %489 = vsyncadd (%p577_p8), %s141_s30, 4294967040  ;;  %v176_v0 = vld [vmem:[%s144_s25] sm:$0xff]  ;;  %v177_v1 = vld [vmem:[%s144_s25 + $0x8] sm:$0xff]  ;;  %s163_s24 = scalar_lea.vmem [#allocation5], %s307_s23  ;;  %s181_s28 = scalar_lea.sflag [#allocation4], %s643_s22 }
  0x45   : > { %178 = vst [vmem:[%s163_s24] sm:$0xff] %v176_v0  ;;  %187 = sbr.rel (!%p581_p9) target bundleno = 106 (0x6a), region = 32  ;;  %s310_s12 = sshll.u32 (%p581_p9), %s508_s9, 1 }
  0x46   : > { %179 = vst [vmem:[%s163_s24 + $0x8] sm:$0xff] %v177_v1  ;;  %s190_s13 = ssub.s32 (%p581_p9), 3, %s310_s12 }
  0x47   : > { %p191_p0 = scmp.lt.s32.totalorder (%p581_p9), %s190_s13, 2 }
  0x4a   : > { %s738_s13 = smov (!%p191_p0, %s190_s13), 2 }
  0x4b   : > { %s311_s17 = sshll.u32 %s738_s13, 3 }
  0x4c   : > { %s194_s15 = ssub.s32 16, %s311_s17 }
  0x4d   : > { %s195_s16 = sshll.u32 %s194_s15, 4 }
  0x4e   : > { %196 = vsyncadd %s181_s28, %s195_s16  ;;  %p660_p8 = scmp.ne.s32.totalorder %s311_s17, 0  ;;  %s322_s26 = sshll.u32 %s508_s9, 3 }
  0x4f   : > { %s201_s2 = scalar_lea.hbm %s722_s1, %s322_s26  ;;  %s314_s3 = sshll.u32 %s738_s13, 2 }
  0x50   : > { %s204_s4 = sshll.u32 %s163_s24, 4  ;;  %s206_s5 = sshll.u32 %s201_s2, 4  ;;  %s669_s4 = int_to_ptr.vmem [resolvable:$true] %s204_s4  ;;  %s671_s5 = int_to_ptr.hbm [resolvable:$true] %s206_s5 }
  0x51   : > { %s324_s21 = sshll.u32 %s738_s13, 7  ;;  %s423_s23 = sshra.s32 %s669_s4, 4  ;;  %s424_s23 = int_to_ptr.vmem [resolvable:$true] %s423_s23 }
  0x52   : > { %s425_s30 = sshrl.u32 %s324_s21, 4  ;;  %s521_s9 = smov [#allocation5]  }
  0x53   : > { %s430_s25 = scalar_lea.vmem %s424_s23, %s425_s30  ;;  %s434_s12 = scalar_lea.vmem %s521_s9, 32 }
  0x54   : > { %p431_p9 = scmp.ne.s32.totalorder %s424_s23, %s430_s25  ;;  %p436_p7 = scmp.lt.s32.totalorder %s434_s12, %s430_s25 }
  0x56   : > { %p432_p5 = pnand %p431_p9, %p660_p8 }
  0x58   : > { %p433_p6 = pneg %p432_p5 }
  0x5a   : > { %p438_p10 = pnand %p436_p7, %p433_p6 }
  0x5c   : > { %441 = shalt.err (!%p438_p10)
}
  0x5d   : > { %s442_s24 = sshra.s32 %s671_s5, 4  ;;  %s453_s26 = scalar_lea.hbm %s722_s1, 24  ;;  %s443_s24 = int_to_ptr.hbm [resolvable:$true] %s442_s24 }
  0x5e   : > { %s449_s17 = scalar_lea.hbm %s443_s24, %s425_s30  ;;  %p454_p3 = scmp.lt.s32.totalorder %s443_s24, %s722_s1 }
  0x5f   : > { %p450_p13 = scmp.ne.s32.totalorder %s443_s24, %s449_s17  ;;  %p455_p4 = scmp.lt.s32.totalorder %s453_s26, %s449_s17 }
  0x61   : > { %p451_p1 = pnand %p450_p13, %p660_p8  ;;  %p456_p0 = por %p455_p4, %p454_p3 }
  0x63   : > { %p452_p2 = pneg %p451_p1 }
  0x65   : > { %p457_p9 = pnand %p456_p0, %p452_p2 }
  0x67   : > { %460 = shalt.err (!%p457_p9)
}
  0x68   : > { %s522_s2 = smov 128   ;;  %s523_s23 = smov 192  }
  0x69   : > { %212 = dma.vmem_to_hbm [thread:$0]  (%p660_p8), %s669_s4, %s324_s21, %s671_s5, %s181_s28, %s522_s2, %s523_s23, %s314_s3  }
  0x6a PF: > { %s221_s30 = sand.u32 1, %s496_s6   ;;  %p328_p5 = pnand %p297_p12, %p588_p11 }
  0x6b   : > { %s222_s25 = scalar_lea.sflag [#allocation4], %s221_s30 }
  0x6c   : > { %p329_p6 = pneg %p328_p5 }
  0x6e   : > { %491 = dma.done.wait (%p329_p6), %s222_s25, 256  }
  0x6f   : > { %493 = vsyncadd (%p329_p6), %s222_s25, 4294967040  ;;  %s17_s11 = sadd.s32 1, %s516_s11   ;;  %s728_s6 = smov %s500_s7 }
  0x70   : > { %p14_p7 = scmp.ge.s32.totalorder %s17_s11, 4   ;;  %s729_s7 = smov %s504_s8 }
  0x71   : > { %s730_s8 = smov %s586_s19  ;;  %s731_s9 = smov %s512_s10 }
  0x72   : > { %s732_s10 = smov %s734_s14  ;;  %16 = sbr.rel (!%p14_p7) target bundleno = 6 (0x6), region = 69 }
  0x77   :  { %228 = vsyncpa [#allocation3], 1 }
  0x78   :  { %230 = vsyncpa [#allocation3 + $0x1], 1 }
  0x79   :  { %231 = vsyncpa [#allocation4], 1 }
  0x7a   :  { %233 = vsyncpa [#allocation4 + $0x1], 1 }

</bundles_post_ra>
